<compile_context>
chip_gen: v6e
topology: v6e:2x2x1
jax: 0.10.0
libtpu: 0.0.40
codegen_flags: <defaults>
</compile_context>

<pallas_src>
import functools

import jax
import jax.numpy as jnp
from jax.experimental import pallas as pl
from jax.experimental.pallas import tpu as pltpu


def _attn_kernel(qf_ref, kf_ref, v_ref, wq_ref, wk_ref, out_ref, attn_ref,
                 *, batch, Lq, Lk):
    d_attn = wq_ref.shape[-1]
    d_v = v_ref.shape[-1]

    # Whole-batch projections: one MXU pass each. Bias and 1/temperature are already
    # folded into the augmented weights/activations by the wrapper.
    qp = jnp.dot(qf_ref[...], wq_ref[...],
                 preferred_element_type=jnp.float32)              # (B*Lq, d_attn)
    kp = jnp.dot(kf_ref[...], wk_ref[...],
                 preferred_element_type=jnp.float32)              # (B*Lk, d_attn)

    # Batched scores: contract over the feature dim (no explicit kp transpose).
    qp3 = qp.reshape(batch, Lq, d_attn)
    kp3 = kp.reshape(batch, Lk, d_attn)
    scores = jnp.einsum("bqd,bkd->bqk", qp3, kp3,
                        preferred_element_type=jnp.float32)       # (B, Lq, Lk)

    # Softmax over the last axis (PyTorch Softmax(dim=2) on [B, Lq, Lk]).
    m = jnp.max(scores, axis=-1, keepdims=True)
    e = jnp.exp(scores - m)
    s = jnp.sum(e, axis=-1, keepdims=True)
    # Exact reciprocal keeps the 1e-5 tolerance; approx=True is an option at looser tol.
    attn = e * pl.reciprocal(s, approx=False)                     # (B, Lq, Lk)

    # Single lane-dense 2-D store per output.
    attn_ref[...] = attn.reshape(batch * Lq, Lk).astype(attn_ref.dtype)

    out = jnp.einsum("bqk,bkd->bqd", attn, v_ref[...],
                     preferred_element_type=jnp.float32)          # (B, Lq, d_v)
    out_ref[...] = out.reshape(batch * Lq, d_v).astype(out_ref.dtype)


def _augment(x2d, w, b, scale):
    """Fold bias (and an optional scale) into the matmul.

    Returns (x_aug, w_aug) such that x_aug @ w_aug == (x2d @ w + b) * scale, with the
    augmented contraction dim padded up to a multiple of 8 (sublane) with zeros.
    """
    n, d_in = x2d.shape
    d_out = w.shape[-1]
    pad = (-(d_in + 1)) % 8
    x_aug = jnp.concatenate(
        [x2d, jnp.ones((n, 1), x2d.dtype), jnp.zeros((n, pad), x2d.dtype)], axis=1)
    w_aug = jnp.concatenate(
        [w, b.reshape(1, d_out), jnp.zeros((pad, d_out), w.dtype)], axis=0) * scale
    return x_aug, w_aug


def scaled_dot_product_attention(q, k, v, wq, bq, wk, bk, temperature):
    """q:[B,Lq,dq] k:[B,Lk,dk] v:[B,Lk,dv]; wq:[dq,da] bq:[1,da]; wk:[dk,da] bk:[1,da].

    `temperature` may be a Python float or a traced scalar (folded in the wrapper).
    """
    B, Lq, d_q = q.shape
    _, Lk, d_k = k.shape
    d_v = v.shape[-1]
    d_attn = wq.shape[-1]

    inv_t = 1.0 / temperature

    # Wrapper-side flatten + bias/temperature folding -> single 2-D MXU matmuls,
    # 5 kernel operands instead of 7.
    qf_aug, wq_aug = _augment(q.reshape(B * Lq, d_q), wq, bq, inv_t)
    kf_aug, wk_aug = _augment(k.reshape(B * Lk, d_k), wk, bk, 1.0)
    dqa = qf_aug.shape[-1]
    dka = kf_aug.shape[-1]

    kernel = functools.partial(_attn_kernel, batch=B, Lq=Lq, Lk=Lk)

    out_shapes = (
        jax.ShapeDtypeStruct((B * Lq, d_v), jnp.float32),
        jax.ShapeDtypeStruct((B * Lq, Lk), jnp.float32),
    )

    grid_spec = pl.GridSpec(
        grid=(1,),  # single invocation: whole (tiny) problem resident in VMEM
        in_specs=[
            pl.BlockSpec((B * Lq, dqa), lambda i: (0, 0)),
            pl.BlockSpec((B * Lk, dka), lambda i: (0, 0)),
            pl.BlockSpec((B, Lk, d_v), lambda i: (0, 0, 0)),
            pl.BlockSpec((dqa, d_attn), lambda i: (0, 0)),
            pl.BlockSpec((dka, d_attn), lambda i: (0, 0)),
        ],
        out_specs=(
            pl.BlockSpec((B * Lq, d_v), lambda i: (0, 0)),
            pl.BlockSpec((B * Lq, Lk), lambda i: (0, 0)),
        ),
    )

    out2d, attn2d = pl.pallas_call(
        kernel,
        out_shape=out_shapes,
        grid_spec=grid_spec,
        compiler_params=pltpu.CompilerParams(
            dimension_semantics=("arbitrary",)),
    )(qf_aug, kf_aug, v, wq_aug, wk_aug)

    return out2d.reshape(B, Lq, d_v), attn2d.reshape(B, Lq, Lk)


def _reference(q, k, v, wq, bq, wk, bk, temperature):
    qp = q @ wq + bq
    kp = k @ wk + bk
    attn = jnp.einsum("bqd,bkd->bqk", qp, kp) / temperature
    attn = jax.nn.softmax(attn, axis=2)
    safe = jnp.where(jnp.isnan(attn), jnp.zeros_like(attn), attn)
    out = jnp.einsum("bqk,bkd->bqd", safe, v)
    return out, safe


if __name__ == "__main__":
    # Small, module-consistent shapes.
    B, Lq, Lk = 2, 8, 8
    d_q, d_k, d_attn, d_v = 32, 32, 32, 32
    temperature = float(d_attn) ** 0.5

    key = jax.random.PRNGKey(0)
    kq, kk, kv, kwq, kwk, kbq, kbk = jax.random.split(key, 7)

    q = jax.random.normal(kq, (B, Lq, d_q), dtype=jnp.float32)
    k = jax.random.normal(kk, (B, Lk, d_k), dtype=jnp.float32)
    v = jax.random.normal(kv, (B, Lk, d_v), dtype=jnp.float32)

    # Xavier-normal weights (std = sqrt(2/(fan_in+fan_out))), stored transposed
    # as [d_in, d_attn]; small deterministic biases.
    std_q = (2.0 / (d_q + d_attn)) ** 0.5
    std_k = (2.0 / (d_k + d_attn)) ** 0.5
    wq = std_q * jax.random.normal(kwq, (d_q, d_attn), dtype=jnp.float32)
    wk = std_k * jax.random.normal(kwk, (d_k, d_attn), dtype=jnp.float32)
    bq = 0.01 * jax.random.normal(kbq, (1, d_attn), dtype=jnp.float32)
    bk = 0.01 * jax.random.normal(kbk, (1, d_attn), dtype=jnp.float32)

    out, attn = scaled_dot_product_attention(q, k, v, wq, bq, wk, bk, temperature)
    out = jax.block_until_ready(out)
    attn = jax.block_until_ready(attn)

    out_ref, attn_ref = _reference(q, k, v, wq, bq, wk, bk, temperature)
    assert jnp.allclose(out, out_ref, atol=1e-5, rtol=1e-5), "output mismatch"
    assert jnp.allclose(attn, attn_ref, atol=1e-5, rtol=1e-5), "attn mismatch"

    print("KERNEL_OK")
</pallas_src>

<mosaic_0001>
module attributes {stable_mosaic.version = 11 : i64} {
  func.func @_attn_kernel(%arg0: i32, %arg1: memref<16x40xf32, #tpu.memory_space<vmem>>, %arg2: memref<16x40xf32, #tpu.memory_space<vmem>>, %arg3: memref<2x8x32xf32, #tpu.memory_space<vmem>>, %arg4: memref<40x32xf32, #tpu.memory_space<vmem>>, %arg5: memref<40x32xf32, #tpu.memory_space<vmem>>, %arg6: memref<16x32xf32, #tpu.memory_space<vmem>>, %arg7: memref<16x8xf32, #tpu.memory_space<vmem>>) attributes {dimension_semantics = [#tpu.dimension_semantics<arbitrary>], iteration_bounds = array<i64: 1>, scalar_prefetch = 0 : i64, scratch_operands = 0 : i64, tpu.core_type = #tpu.core_type<tc>, window_params = [{pipeline_mode = #tpu.pipeline_mode<synchronous>, transform_indices = @transform_0, window_bounds = array<i64: 16, 40>}, {pipeline_mode = #tpu.pipeline_mode<synchronous>, transform_indices = @transform_1, window_bounds = array<i64: 16, 40>}, {pipeline_mode = #tpu.pipeline_mode<synchronous>, transform_indices = @transform_2, window_bounds = array<i64: 2, 8, 32>}, {pipeline_mode = #tpu.pipeline_mode<synchronous>, transform_indices = @transform_3, window_bounds = array<i64: 40, 32>}, {pipeline_mode = #tpu.pipeline_mode<synchronous>, transform_indices = @transform_4, window_bounds = array<i64: 40, 32>}, {pipeline_mode = #tpu.pipeline_mode<synchronous>, transform_indices = @transform_5, window_bounds = array<i64: 16, 32>}, {pipeline_mode = #tpu.pipeline_mode<synchronous>, transform_indices = @transform_6, window_bounds = array<i64: 16, 8>}]} {
    %c0 = arith.constant 0 : index
    %c0_0 = arith.constant 0 : index
    %0 = vector.load %arg1[%c0, %c0_0] : memref<16x40xf32, #tpu.memory_space<vmem>>, vector<16x40xf32>
    %c0_1 = arith.constant 0 : index
    %c0_2 = arith.constant 0 : index
    %1 = vector.load %arg4[%c0_1, %c0_2] : memref<40x32xf32, #tpu.memory_space<vmem>>, vector<40x32xf32>
    %cst = arith.constant dense<0.000000e+00> : vector<16x32xf32>
    %2 = tpu.matmul %0, %1, %cst {dimension_numbers = #tpu.dot_dimension_numbers<[1], [0], [0], [1], [0, 0, 1, 1], [], []>} : vector<16x40xf32>, vector<40x32xf32>, vector<16x32xf32> -> vector<16x32xf32>
    %c0_3 = arith.constant 0 : index
    %c0_4 = arith.constant 0 : index
    %3 = vector.load %arg2[%c0_3, %c0_4] : memref<16x40xf32, #tpu.memory_space<vmem>>, vector<16x40xf32>
    %c0_5 = arith.constant 0 : index
    %c0_6 = arith.constant 0 : index
    %4 = vector.load %arg5[%c0_5, %c0_6] : memref<40x32xf32, #tpu.memory_space<vmem>>, vector<40x32xf32>
    %cst_7 = arith.constant dense<0.000000e+00> : vector<16x32xf32>
    %5 = tpu.matmul %3, %4, %cst_7 {dimension_numbers = #tpu.dot_dimension_numbers<[1], [0], [0], [1], [0, 0, 1, 1], [], []>} : vector<16x40xf32>, vector<40x32xf32>, vector<16x32xf32> -> vector<16x32xf32>
    %6 = vector.shape_cast %2 : vector<16x32xf32> to vector<2x8x32xf32>
    %7 = vector.shape_cast %5 : vector<16x32xf32> to vector<2x8x32xf32>
    "tpu.trace_start"() <{level = 10 : i32, message = "bqd,bkd->bqk"}> : () -> ()
    %cst_8 = arith.constant dense<0.000000e+00> : vector<2x8x8xf32>
    %8 = tpu.matmul %6, %7, %cst_8 {dimension_numbers = #tpu.dot_dimension_numbers<[2], [2], [1], [1], [0, 0, 0, 1, 1, 1], [0], [0]>} : vector<2x8x32xf32>, vector<2x8x32xf32>, vector<2x8x8xf32> -> vector<2x8x8xf32>
    "tpu.trace_stop"() : () -> ()
    %cst_9 = arith.constant dense<0xFF800000> : vector<2x8xf32>
    %9 = vector.multi_reduction <maximumf>, %8, %cst_9 [2] : vector<2x8x8xf32> to vector<2x8xf32>
    %10 = vector.shape_cast %9 : vector<2x8xf32> to vector<2x8x1xf32>
    %11 = vector.broadcast %10 : vector<2x8x1xf32> to vector<2x8x8xf32>
    %12 = arith.subf %8, %11 : vector<2x8x8xf32>
    %13 = math.exp %12 : vector<2x8x8xf32>
    %cst_10 = arith.constant dense<0.000000e+00> : vector<2x8xf32>
    %14 = vector.multi_reduction <add>, %13, %cst_10 [2] : vector<2x8x8xf32> to vector<2x8xf32>
    %15 = vector.shape_cast %14 : vector<2x8xf32> to vector<2x8x1xf32>
    %16 = tpu.reciprocal %15 : vector<2x8x1xf32> -> vector<2x8x1xf32>
    %17 = vector.broadcast %16 : vector<2x8x1xf32> to vector<2x8x8xf32>
    %18 = arith.mulf %13, %17 : vector<2x8x8xf32>
    %19 = vector.shape_cast %18 : vector<2x8x8xf32> to vector<16x8xf32>
    %c0_11 = arith.constant 0 : index
    %c0_12 = arith.constant 0 : index
    %20 = vector.load %arg7[%c0_11, %c0_12] : memref<16x8xf32, #tpu.memory_space<vmem>>, vector<16x8xf32>
    tpu.vector_store %arg7[%c0_11, %c0_12], %19 {strides = array<i32>} : memref<16x8xf32, #tpu.memory_space<vmem>>, vector<16x8xf32>,
    %c0_13 = arith.constant 0 : index
    %c0_14 = arith.constant 0 : index
    %c0_15 = arith.constant 0 : index
    %21 = vector.load %arg3[%c0_13, %c0_14, %c0_15] : memref<2x8x32xf32, #tpu.memory_space<vmem>>, vector<2x8x32xf32>
    "tpu.trace_start"() <{level = 10 : i32, message = "bqk,bkd->bqd"}> : () -> ()
    %cst_16 = arith.constant dense<0.000000e+00> : vector<2x8x32xf32>
    %22 = tpu.matmul %18, %21, %cst_16 {dimension_numbers = #tpu.dot_dimension_numbers<[2], [1], [1], [2], [0, 0, 0, 1, 1, 2], [0], [0]>} : vector<2x8x8xf32>, vector<2x8x32xf32>, vector<2x8x32xf32> -> vector<2x8x32xf32>
    "tpu.trace_stop"() : () -> ()
    %23 = vector.shape_cast %22 : vector<2x8x32xf32> to vector<16x32xf32>
    %c0_17 = arith.constant 0 : index
    %c0_18 = arith.constant 0 : index
    %24 = vector.load %arg6[%c0_17, %c0_18] : memref<16x32xf32, #tpu.memory_space<vmem>>, vector<16x32xf32>
    tpu.vector_store %arg6[%c0_17, %c0_18], %23 {strides = array<i32>} : memref<16x32xf32, #tpu.memory_space<vmem>>, vector<16x32xf32>,
    return
  }
  func.func @transform_0(%arg0: i32) -> (i32, i32) {
    %c0_i32 = arith.constant 0 : i32
    %c0_i32_0 = arith.constant 0 : i32
    %c0_i32_1 = arith.constant 0 : i32
    return %c0_i32, %c0_i32_0 : i32, i32
  }
  func.func @transform_1(%arg0: i32) -> (i32, i32) {
    %c0_i32 = arith.constant 0 : i32
    %c0_i32_0 = arith.constant 0 : i32
    %c0_i32_1 = arith.constant 0 : i32
    return %c0_i32, %c0_i32_0 : i32, i32
  }
  func.func @transform_2(%arg0: i32) -> (i32, i32, i32) {
    %c0_i32 = arith.constant 0 : i32
    %c0_i32_0 = arith.constant 0 : i32
    %c0_i32_1 = arith.constant 0 : i32
    %c0_i32_2 = arith.constant 0 : i32
    return %c0_i32, %c0_i32_0, %c0_i32_1 : i32, i32, i32
  }
  func.func @transform_3(%arg0: i32) -> (i32, i32) {
    %c0_i32 = arith.constant 0 : i32
    %c0_i32_0 = arith.constant 0 : i32
    %c0_i32_1 = arith.constant 0 : i32
    return %c0_i32, %c0_i32_0 : i32, i32
  }
  func.func @transform_4(%arg0: i32) -> (i32, i32) {
    %c0_i32 = arith.constant 0 : i32
    %c0_i32_0 = arith.constant 0 : i32
    %c0_i32_1 = arith.constant 0 : i32
    return %c0_i32, %c0_i32_0 : i32, i32
  }
  func.func @transform_5(%arg0: i32) -> (i32, i32) {
    %c0_i32 = arith.constant 0 : i32
    %c0_i32_0 = arith.constant 0 : i32
    %c0_i32_1 = arith.constant 0 : i32
    return %c0_i32, %c0_i32_0 : i32, i32
  }
  func.func @transform_6(%arg0: i32) -> (i32, i32) {
    %c0_i32 = arith.constant 0 : i32
    %c0_i32_0 = arith.constant 0 : i32
    %c0_i32_1 = arith.constant 0 : i32
    return %c0_i32, %c0_i32_0 : i32, i32
  }
}

</mosaic_0001>

<bundles_post_ra>
// kernel: tpu_custom_call.1
= control target key start
LH: loop header
LB: loop body
LE: loop exit
PB: predicated region body
PF: predicated region fallthrough
CT: control target
= control target key end

     0   :  { %s776_s0 = inlined_call_operand.vmem [shape: f32[16,40], index: 0, kind: input, shape index: {}]   ;;  %s777_s1 = inlined_call_operand.vmem [shape: f32[16,40], index: 1, kind: input, shape index: {}]   ;;  %s778_s2 = inlined_call_operand.vmem [shape: f32[2,8,32], index: 2, kind: input, shape index: {}]   ;;  %s779_s3 = inlined_call_operand.vmem [shape: f32[40,32], index: 3, kind: input, shape index: {}]   ;;  %s780_s4 = inlined_call_operand.vmem [shape: f32[40,32], index: 4, kind: input, shape index: {}]   ;;  %s781_s5 = inlined_call_operand.hbm [shape: f32[16,32], index: 5, kind: output, shape index: {0}]   ;;  %s782_s6 = inlined_call_operand.vmem [shape: f32[16,8], index: 6, kind: output, shape index: {1}]  }
   0x1   :  { %v118_v0 = vld [vmem:[%s780_s4 + $0x20] sm:$0xff]  ;;  %v117_v2 = vld [vmem:[%s780_s4 + $0x18] sm:$0xff]  ;;  %v116_v4 = vld [vmem:[%s780_s4 + $0x10] sm:$0xff] }
   0x2   :  { %v29_v1 = vld [vmem:[%s779_s3 + $0x20] sm:$0xff]  ;;  %593 = vmatprep.subr.mxu1 %v118_v0  ;;  %v28_v3 = vld [vmem:[%s779_s3 + $0x18] sm:$0xff]  ;;  %v27_v5 = vld [vmem:[%s779_s3 + $0x10] sm:$0xff] }
   0x3   :  { %580 = vmatprep.subr.mxu0 %v29_v1  ;;  %594 = vmatpush3.msra.mxu1 %v118_v0  ;;  %v115_v6 = vld [vmem:[%s780_s4 + $0x8] sm:$0xff] }
   0x4   :  { %581 = vmatpush3.msra.mxu0 %v29_v1  ;;  %595 = vmatprep.subr.mxu1 %v117_v2  ;;  %v26_v7 = vld [vmem:[%s779_s3 + $0x8] sm:$0xff] }
   0x5   :  { %582 = vmatprep.subr.mxu0 %v28_v3  ;;  %596 = vmatpush3.msra.mxu1 %v117_v2 }
   0x6   :  { %583 = vmatpush3.msra.mxu0 %v28_v3 }
   0x7   :  { %12 = vsyncpa [#allocation3], 0  ;;  %597 = vmatprep.subr.mxu1 %v116_v4  ;;  %584 = vmatprep.subr.mxu0 %v27_v5  ;;  %v114_v8 = vld [vmem:[%s780_s4] sm:$0xff]  ;;  %vm30_vm0 = vcmask 326656   ;;  %v113_v11 = vld [vmem:[%s777_s1 + $0x8] sm:$0xff]  ;;  %v661_v14 = vmov 0.0  }
   0x8   :  { %598 = vmatpush3.msra.mxu1 %v116_v4  ;;  %585 = vmatpush3.msra.mxu0 %v27_v5  ;;  %v112_v9 = vld [vmem:[%s777_s1] sm:$0xff]  ;;  %v24_v13 = vld [vmem:[%s776_s0 + $0x8] sm:$0xff]  ;;  %vm662_vm1 = vmmov 0   ;;  %vm200_vm2 = vcmask 261120   ;;  %vm353_vm3 = vcmask 64512  }
   0x9   :  { %599 = vmatprep.subr.mxu1 %v115_v6  ;;  %586 = vmatprep.subr.mxu0 %v26_v7  ;;  %v25_v10 = vld [vmem:[%s779_s3] sm:$0xff]  ;;  %v379_v36 = vld [vmem:[%s778_s2 + $0x8] sm:$0xff] }
   0xa   :  { %600 = vmatpush3.msra.mxu1 %v115_v6  ;;  %587 = vmatpush3.msra.mxu0 %v26_v7  ;;  %v23_v12 = vld [vmem:[%s776_s0] sm:$0xff] }
   0xb   :  { %601 = vmatprep.subr.mxu1 %v114_v8  ;;  %603 = vmatprep.mubr.msk.f32.mxu1 %vm30_vm0, %v112_v9  ;;  %v378_v35 = vld [vmem:[%s778_s2] sm:$0xff]  ;;  %s663_s2 = smov [#allocation2]  }
   0xc   :  { %602 = vmatpush3.msra.mxu1 %v114_v8  ;;  %588 = vmatprep.subr.mxu0 %v25_v10  ;;  %s533_s29 = sshll.u32 %s663_s2, 4  ;;  %s534_s29 = int_to_ptr.vmem [resolvable:$true] %s533_s29 }
   0xd   :  { %604 = vmatmul.mubr.msk.f32.vlgmr.msra.gmra.mxu1 %vm30_vm0, %v113_v11  ;;  %589 = vmatpush3.msra.mxu0 %v25_v10  ;;  %s639_s30 = scalar_lea.vmem %s534_s29, 256  ;;  %p644_p1 = scmp.lt.s32.totalorder %s534_s29, %s534_s29 }
   0xe   :  { %590 = vmatprep.mubr.msk.f32.mxu0 %vm30_vm0, %v23_v12  ;;  %611 = vmatprep.subr.mxu1 %v661_v14  ;;  %p640_p0 = scmp.ne.s32.totalorder %s534_s29, %s639_s30  ;;  %p645_p2 = scmp.lt.s32.totalorder %s639_s30, %s639_s30 }
   0xf   :  { %591 = vmatmul.mubr.msk.f32.vlgmr.msra.gmra.mxu0 %vm30_vm0, %v24_v13  ;;  %606 = vmatprep.subr.mxu0 %v661_v14 }
  0x10   :  { %613 = vmatprep.mubr.msk.f32.mxu1 %vm662_vm1, %v661_v14  ;;  %608 = vmatprep.mubr.msk.f32.mxu0 %vm662_vm1, %v661_v14  ;;  %p646_p3 = por %p645_p2, %p644_p1 }
  0x12   :  { %p647_p4 = pnand %p646_p3, %p640_p0 }
  0xcd   :  { %v605_v15 = vpop.f32.mrf.mxu1 }
  0xce   :  { %612 = vmatpush3.xpose.msk.msra.mxu1 %vm200_vm2, %v605_v15 }
  0xcf   :  { %v592_v16 = vpop.f32.mrf.mxu0  ;;  %v191_v17 = vpop.f32.mrf.mxu1  ;;  %621 = vmatprep.subr.mxu1 %v661_v14 }
  0xd0   :  { %607 = vmatpush3.xpose.msk.msra.mxu0 %vm200_vm2, %v191_v17 }
  0xd1   :  { %614 = vmatmul.mubr.msk.f32.vlgmr.msra.gmra.mxu1 %vm200_vm2, %v592_v16  ;;  %616 = vmatprep.subr.mxu0 %v661_v14  ;;  %v103_v18 = vpop.f32.mrf.mxu0 }
  0xd2   :  { %623 = vmatprep.mubr.msk.f32.mxu1 %vm662_vm1, %v661_v14  ;;  %622 = vmatpush3.msra.mxu1 %v379_v36 }
  0xd3   :  { %609 = vmatmul.mubr.msk.f32.vlgmr.msra.gmra.mxu0 %vm200_vm2, %v103_v18 }
  0xd4   :  { %618 = vmatprep.mubr.msk.f32.mxu0 %vm662_vm1, %v661_v14  ;;  %617 = vmatpush3.msra.mxu0 %v378_v35 }
 0x191   :  { %v349_v19 = vpop.f32.mrf.mxu1 }
 0x192   :  { %v357_v24 = vsel %vm353_vm3, %v349_v19, -inf }
 0x193   :  { %v273_v20 = vpop.f32.mrf.mxu0  ;;  %v615_v21 = vpop.f32.mrf.mxu1 }
 0x194   :  { %v354_v22 = vsel %vm353_vm3, %v273_v20, -inf }
 0x195   :  { %355 = vmax.xlane.f32.xlu0 %v354_v22  ;;  %v610_v23 = vpop.f32.mrf.mxu0 }
 0x199   :  { %358 = vmax.xlane.f32.xlu0 %v357_v24 }
 0x21e   :  { %v356_v25 = vpop.xlane.xlu0 %355 }
 0x21f   :  { %v360_v26 = vsub.f32 %v273_v20, %v356_v25 }
 0x221   :  { %v362_v27 = vmul.f32 1.442695, %v360_v26 }
 0x222   :  { %v359_v28 = vpop.xlane.xlu0 %358 }
 0x223   :  { %631 = vpow2.f32 %v362_v27  ;;  %v361_v29 = vsub.f32 %v349_v19, %v359_v28 }
 0x225   :  { %v364_v30 = vmul.f32 1.442695, %v361_v29 }
 0x227   :  { %633 = vpow2.f32 %v364_v30 }
 0x230   :  { %v632_v31 = vpop.eup %631 }
 0x231   :  { %v366_v32 = vsel %vm353_vm3, %v632_v31, 0.0 }
 0x232   :  { %367 = vadd.xlane.f32.xlu1 %v366_v32 }
 0x234   :  { %v634_v33 = vpop.eup %633 }
 0x235   :  { %v369_v34 = vsel %vm353_vm3, %v634_v33, 0.0 }
 0x236   :  { %370 = vadd.xlane.f32.xlu1 %v369_v34 }
 0x2bb   :  { %v368_v37 = vpop.xlane.xlu1 %367 }
 0x2bc   :  { %635 = vrcp.f32 %v368_v37 }
 0x2bf   :  { %v371_v38 = vpop.xlane.xlu1 %370 }
 0x2c0   :  { %637 = vrcp.f32 %v371_v38 }
 0x2c9   :  { %v636_v39 = vpop.eup %635 }
 0x2ca   :  { %v374_v40 = vmul.f32 %v636_v39, %v632_v31 }
 0x2cc   :  { %376 = vst.msk [vmem:[%s782_s6] sm:$0xff] %vm353_vm3, %v374_v40  ;;  %619 = vmatmul.mubr.msk.f32.vlgmr.msra.gmra.mxu0 %vm353_vm3, %v374_v40 }
 0x2cd   :  { %v638_v41 = vpop.eup %637 }
 0x2ce   :  { %v375_v42 = vmul.f32 %v638_v41, %v634_v33 }
 0x2d0   :  { %377 = vst.msk [vmem:[%s782_s6 + $0x8] sm:$0xff] %vm353_vm3, %v375_v42  ;;  %624 = vmatmul.mubr.msk.f32.vlgmr.msra.gmra.mxu1 %vm353_vm3, %v375_v42 }
 0x38c   :  { %v449_v43 = vpop.f32.mrf.mxu0 }
 0x38d   :  { %526 = vst.msk [vmem:[#allocation2] sm:$0xff] %vm200_vm2, %v449_v43 }
 0x38e   :  { %v620_v44 = vpop.f32.mrf.mxu0 }
 0x390   :  { %v522_v45 = vpop.f32.mrf.mxu1 }
 0x391   :  { %527 = vst.msk [vmem:[#allocation2 + $0x8] sm:$0xff] %vm200_vm2, %v522_v45 }
 0x392   :  { %v625_v46 = vpop.f32.mrf.mxu1 }
 0x393   :  { %650 = shalt.err (!%p647_p4)
}
 0x394   :  { %s664_s6 = smov 128   ;;  %s665_s7 = smov 8  }
 0x395   :  { %539 = dma.vmem_to_hbm [thread:$0]  %s534_s29, 256, %s781_s5, [#allocation3], %s664_s6, %s664_s6, %s665_s7  }
 0x396   :  { %659 = dma.done.wait [#allocation3], 256  }
 0x397   :  { %660 = vsyncadd [#allocation3], 4294967040 }
 0x398   :  { %547 = vsyncpa [#allocation3], 1 }

</bundles_post_ra>
